<compile_context>
chip_gen: v7x
topology: tpu7x:2x2x1
jax: 0.10.0
libtpu: 0.0.40
codegen_flags: <defaults>
</compile_context>

<pallas_src>
import jax
import jax.numpy as jnp
from jax.experimental import pallas as pl
from jax.experimental.pallas import tpu as pltpu


def st_operator_kernel(x_ref,        # (T*B, I)  time-major, flattened, compute dtype
                       h0_ref,       # (B, H)    float32
                       w_sp_ref,     # (I, S)    compute dtype
                       w_ih_ref,     # (S, 3H)   compute dtype, gate order [r|z|n]
                       w_hh_ref,     # (H, 3H)   float32 (serial path stays f32)
                       w_fc_ref,     # (H, O)    float32
                       b_ref,        # (8, Wb)   float32 packed biases
                       out_ref):     # (B, O)    float32
    TB = x_ref.shape[0]
    B, H = h0_ref.shape
    T = TB // B
    S = w_sp_ref.shape[1]
    O = w_fc_ref.shape[1]

    # Packed biases (one DMA): row 0 = b_sp, row 1 = b_i ([r|z|n], r/z include b_hh),
    # row 2 = b_hn (must stay inside r*(...)), row 3 = b_fc. Static slices from lane 0.
    b_sp = b_ref[0:1, :S]
    b_i = b_ref[1:2, :3 * H]
    b_hn = jnp.broadcast_to(b_ref[2:3, :H], (B, H))
    b_fc = b_ref[3:4, :O]

    # ---- stage 1: space encoder. Conv1d(kernel_size=1)+ReLU over all timesteps as
    # one 2-D matmul (B and T folded into M) — single MXU pass, f32 accumulation.
    xe = jnp.maximum(
        jnp.dot(x_ref[...], w_sp_ref[...], preferred_element_type=jnp.float32)
        + b_sp, 0.0)                                                  # (T*B, S) f32

    # ---- stage 2: hoisted, fused GRU input projection: one (T*B,S)@(S,3H) matmul.
    # Result stays vreg-resident (no VMEM scratch); r/z biases already fold b_hh.
    gi = (jnp.dot(xe.astype(w_ih_ref.dtype), w_ih_ref[...],
                  preferred_element_type=jnp.float32)
          + b_i)                                                      # (T*B, 3H) f32

    # Hoist recurrent weights (f32 -> no per-step cast on the serial chain).
    w_hh = w_hh_ref[...]

    # ---- stage 3: GRU recurrence, fully unrolled (T static). One fused
    # (B,H)@(H,3H) matmul per step; lane-offset gate slices go to the idle XLU.
    h = h0_ref[...]                                                   # (B, H) f32
    for t in range(T):
        gi_t = gi[t * B:(t + 1) * B, :]                               # static slice
        gh = jnp.dot(h, w_hh, preferred_element_type=jnp.float32)     # (B, 3H)
        r = jax.nn.sigmoid(gi_t[:, :H] + gh[:, :H])
        z = jax.nn.sigmoid(gi_t[:, H:2 * H] + gh[:, H:2 * H])
        n = jnp.tanh(gi_t[:, 2 * H:] + r * (gh[:, 2 * H:] + b_hn))
        h = (1.0 - z) * n + z * h

    # ---- stage 4: fc (Flatten is a no-op on (B, H)) + Linear(time_dim, outputs_dim)
    out_ref[...] = (jnp.dot(h, w_fc_ref[...], preferred_element_type=jnp.float32)
                    + b_fc).astype(out_ref.dtype)


def spatiotemporal_operator(x, h, params, *, compute_dtype=jnp.float32):
    """x: (B, T, I) batch-first; h: (B, H). Returns (B, O) float32."""
    B, T, I = x.shape
    S = params['w_sp'].shape[1]
    H = h.shape[1]
    O = params['w_fc'].shape[1]
    cd = compute_dtype

    # Layout plumbing outside the kernel (free): time-major, flattened to 2-D.
    x_tm = jnp.transpose(x, (1, 0, 2)).reshape(T * B, I).astype(cd)

    # Fold b_hh into b_ih for r/z only; b_hn stays separate (inside r*(...)).
    b_ih, b_hh = params['b_ih'], params['b_hh']                       # (1, 3H) each
    b_i = jnp.concatenate([b_ih[:, :2 * H] + b_hh[:, :2 * H], b_ih[:, 2 * H:]], axis=1)
    b_hn = b_hh[:, 2 * H:]

    # Pack all small biases into one lane-aligned (8, Wb) f32 slab (single DMA).
    Wb = 128 * pl.cdiv(max(S, 3 * H, H, O), 128)
    biases = jnp.zeros((8, Wb), jnp.float32)
    biases = biases.at[0, :S].set(params['b_sp'][0])
    biases = biases.at[1, :3 * H].set(b_i[0])
    biases = biases.at[2, :H].set(b_hn[0])
    biases = biases.at[3, :O].set(params['b_fc'][0])

    args = (x_tm,
            h.astype(jnp.float32),
            params['w_sp'].astype(cd),
            params['w_ih'].astype(cd),              # (S, 3H) fused, gate order [r|z|n]
            params['w_hh'].astype(jnp.float32),     # recurrent weights stay f32
            params['w_fc'].astype(jnp.float32),
            biases)

    flops = (2 * T * B * I * S            # pointwise conv
             + 2 * T * B * S * (3 * H)    # fused hoisted input projection
             + T * 2 * B * H * (3 * H)    # fused recurrent projection per step
             + 2 * B * H * O)             # fc
    cost = pl.CostEstimate(
        flops=int(flops),
        transcendentals=int(3 * T * B * H),
        bytes_accessed=int(sum(a.size * a.dtype.itemsize for a in args) + B * O * 4))

    vmem = pl.BlockSpec(memory_space=pltpu.MemorySpace.VMEM)
    return pl.pallas_call(
        st_operator_kernel,
        out_shape=jax.ShapeDtypeStruct((B, O), jnp.float32),
        in_specs=[vmem] * len(args),
        out_specs=vmem,
        cost_estimate=cost,
    )(*args)


def reference_jax(x, h, params):
    """Pure-JAX float32 reference mirroring the PyTorch forward semantics."""
    H = h.shape[1]
    xe = jnp.maximum(jnp.einsum('bti,is->bts', x, params['w_sp']) + params['b_sp'], 0.0)

    def step(h, x_t):
        gi = x_t @ params['w_ih'] + params['b_ih']
        gh = h @ params['w_hh'] + params['b_hh']
        r = jax.nn.sigmoid(gi[:, :H] + gh[:, :H])
        z = jax.nn.sigmoid(gi[:, H:2 * H] + gh[:, H:2 * H])
        n = jnp.tanh(gi[:, 2 * H:] + r * gh[:, 2 * H:])
        return (1.0 - z) * n + z * h, None

    h_last, _ = jax.lax.scan(step, h.astype(jnp.float32),
                             jnp.transpose(xe, (1, 0, 2)))
    return h_last @ params['w_fc'] + params['b_fc']


def make_params(key, inputs_dim, outputs_dim, space_dim, time_dim):
    ks = jax.random.split(key, 8)
    scale = 0.1
    # Conv1d weight (space_dim, inputs_dim, 1) -> stored transposed as (I, S)
    w_sp = scale * jax.random.normal(ks[0], (inputs_dim, space_dim), jnp.float32)
    b_sp = scale * jax.random.normal(ks[1], (1, space_dim), jnp.float32)
    # GRU weight_ih_l0 (3H, S) / weight_hh_l0 (3H, H), stored transposed; gate order [r, z, n]
    w_ih = scale * jax.random.normal(ks[2], (space_dim, 3 * time_dim), jnp.float32)
    w_hh = scale * jax.random.normal(ks[3], (time_dim, 3 * time_dim), jnp.float32)
    b_ih = scale * jax.random.normal(ks[4], (1, 3 * time_dim), jnp.float32)
    b_hh = scale * jax.random.normal(ks[5], (1, 3 * time_dim), jnp.float32)
    # Linear(time_dim, outputs_dim) weight (O, H) -> stored transposed as (H, O)
    w_fc = scale * jax.random.normal(ks[6], (time_dim, outputs_dim), jnp.float32)
    b_fc = scale * jax.random.normal(ks[7], (1, outputs_dim), jnp.float32)
    return dict(w_sp=w_sp, b_sp=b_sp, w_ih=w_ih, w_hh=w_hh,
                b_ih=b_ih, b_hh=b_hh, w_fc=w_fc, b_fc=b_fc)


if __name__ == "__main__":
    batch, seq = 2, 8
    inputs_dim, outputs_dim = 4, 4
    space_embedding_dim, time_embedding_dim = 32, 32

    key = jax.random.PRNGKey(0)
    kx, kh, kp = jax.random.split(key, 3)
    x = jax.random.normal(kx, (batch, seq, inputs_dim), jnp.float32)
    h = jax.random.normal(kh, (batch, time_embedding_dim), jnp.float32)
    params = make_params(kp, inputs_dim, outputs_dim,
                         space_embedding_dim, time_embedding_dim)

    y_ref = reference_jax(x, h, params)

    # float32 path (strict correctness check)
    y = jax.block_until_ready(spatiotemporal_operator(x, h, params))
    assert y.shape == (batch, outputs_dim)
    assert jnp.allclose(y, y_ref, atol=1e-4, rtol=1e-4), (y, y_ref)

    # bf16-MXU path (v6e/v7x): bf16 only on the hoisted stage-1/2 matmuls;
    # recurrent state, recurrent weights, fc and all accumulation stay float32.
    # Loose tolerance documents the bf16 rounding of stage-1/2.
    y_bf16 = jax.block_until_ready(
        spatiotemporal_operator(x, h, params, compute_dtype=jnp.bfloat16))
    assert jnp.allclose(y_bf16, y_ref, atol=5e-2, rtol=5e-2), (y_bf16, y_ref)

    print("KERNEL_OK")
</pallas_src>

<mosaic_0001>
module attributes {stable_mosaic.version = 11 : i64} {
  func.func @st_operator_kernel(%arg0: memref<16x4xf32, #tpu.memory_space<vmem>>, %arg1: memref<2x32xf32, #tpu.memory_space<vmem>>, %arg2: memref<4x32xf32, #tpu.memory_space<vmem>>, %arg3: memref<32x96xf32, #tpu.memory_space<vmem>>, %arg4: memref<32x96xf32, #tpu.memory_space<vmem>>, %arg5: memref<32x4xf32, #tpu.memory_space<vmem>>, %arg6: memref<8x128xf32, #tpu.memory_space<vmem>>, %arg7: memref<2x4xf32, #tpu.memory_space<vmem>>) attributes {dimension_semantics = [], scalar_prefetch = 0 : i64, scratch_operands = 0 : i64, tpu.core_type = #tpu.core_type<tc>} {
    %c0 = arith.constant 0 : index
    %c0_0 = arith.constant 0 : index
    %0 = vector.load %arg6[%c0, %c0_0] : memref<8x128xf32, #tpu.memory_space<vmem>>, vector<1x32xf32>
    %c1 = arith.constant 1 : index
    %c0_1 = arith.constant 0 : index
    %1 = vector.load %arg6[%c1, %c0_1] : memref<8x128xf32, #tpu.memory_space<vmem>>, vector<1x96xf32>
    %c2 = arith.constant 2 : index
    %c0_2 = arith.constant 0 : index
    %2 = vector.load %arg6[%c2, %c0_2] : memref<8x128xf32, #tpu.memory_space<vmem>>, vector<1x32xf32>
    %3 = vector.shape_cast %2 : vector<1x32xf32> to vector<1x32xf32>
    %4 = vector.broadcast %3 : vector<1x32xf32> to vector<2x32xf32>
    %c3 = arith.constant 3 : index
    %c0_3 = arith.constant 0 : index
    %5 = vector.load %arg6[%c3, %c0_3] : memref<8x128xf32, #tpu.memory_space<vmem>>, vector<1x4xf32>
    %c0_4 = arith.constant 0 : index
    %c0_5 = arith.constant 0 : index
    %6 = vector.load %arg0[%c0_4, %c0_5] : memref<16x4xf32, #tpu.memory_space<vmem>>, vector<16x4xf32>
    %c0_6 = arith.constant 0 : index
    %c0_7 = arith.constant 0 : index
    %7 = vector.load %arg2[%c0_6, %c0_7] : memref<4x32xf32, #tpu.memory_space<vmem>>, vector<4x32xf32>
    %cst = arith.constant dense<0.000000e+00> : vector<16x32xf32>
    %8 = tpu.matmul %6, %7, %cst {dimension_numbers = #tpu.dot_dimension_numbers<[1], [0], [0], [1], [0, 0, 1, 1], [], []>} : vector<16x4xf32>, vector<4x32xf32>, vector<16x32xf32> -> vector<16x32xf32>
    %9 = vector.broadcast %0 : vector<1x32xf32> to vector<16x32xf32>
    %10 = arith.addf %8, %9 : vector<16x32xf32>
    %cst_8 = arith.constant 0.000000e+00 : f32
    %11 = vector.broadcast %cst_8 : f32 to vector<16x32xf32>
    %12 = arith.maximumf %10, %11 : vector<16x32xf32>
    %c0_9 = arith.constant 0 : index
    %c0_10 = arith.constant 0 : index
    %13 = vector.load %arg3[%c0_9, %c0_10] : memref<32x96xf32, #tpu.memory_space<vmem>>, vector<32x96xf32>
    %cst_11 = arith.constant dense<0.000000e+00> : vector<16x96xf32>
    %14 = tpu.matmul %12, %13, %cst_11 {dimension_numbers = #tpu.dot_dimension_numbers<[1], [0], [0], [1], [0, 0, 1, 1], [], []>} : vector<16x32xf32>, vector<32x96xf32>, vector<16x96xf32> -> vector<16x96xf32>
    %15 = vector.broadcast %1 : vector<1x96xf32> to vector<16x96xf32>
    %16 = arith.addf %14, %15 : vector<16x96xf32>
    %c0_12 = arith.constant 0 : index
    %c0_13 = arith.constant 0 : index
    %17 = vector.load %arg4[%c0_12, %c0_13] : memref<32x96xf32, #tpu.memory_space<vmem>>, vector<32x96xf32>
    %c0_14 = arith.constant 0 : index
    %c0_15 = arith.constant 0 : index
    %18 = vector.load %arg1[%c0_14, %c0_15] : memref<2x32xf32, #tpu.memory_space<vmem>>, vector<2x32xf32>
    %19 = vector.extract_strided_slice %16 {offsets = [0, 0], sizes = [2, 96], strides = [1, 1]} : vector<16x96xf32> to vector<2x96xf32>
    %cst_16 = arith.constant dense<0.000000e+00> : vector<2x96xf32>
    %20 = tpu.matmul %18, %17, %cst_16 {dimension_numbers = #tpu.dot_dimension_numbers<[1], [0], [0], [1], [0, 0, 1, 1], [], []>} : vector<2x32xf32>, vector<32x96xf32>, vector<2x96xf32> -> vector<2x96xf32>
    %21 = vector.extract_strided_slice %19 {offsets = [0, 0], sizes = [2, 32], strides = [1, 1]} : vector<2x96xf32> to vector<2x32xf32>
    %22 = vector.extract_strided_slice %20 {offsets = [0, 0], sizes = [2, 32], strides = [1, 1]} : vector<2x96xf32> to vector<2x32xf32>
    %23 = arith.addf %21, %22 : vector<2x32xf32>
    %24 = arith.negf %23 : vector<2x32xf32>
    %25 = math.exp %24 : vector<2x32xf32>
    %cst_17 = arith.constant 1.000000e+00 : f32
    %26 = vector.broadcast %cst_17 : f32 to vector<2x32xf32>
    %27 = arith.addf %26, %25 : vector<2x32xf32>
    %28 = arith.divf %26, %27 : vector<2x32xf32>
    %29 = vector.extract_strided_slice %19 {offsets = [0, 32], sizes = [2, 32], strides = [1, 1]} : vector<2x96xf32> to vector<2x32xf32>
    %30 = vector.extract_strided_slice %20 {offsets = [0, 32], sizes = [2, 32], strides = [1, 1]} : vector<2x96xf32> to vector<2x32xf32>
    %31 = arith.addf %29, %30 : vector<2x32xf32>
    %32 = arith.negf %31 : vector<2x32xf32>
    %33 = math.exp %32 : vector<2x32xf32>
    %cst_18 = arith.constant 1.000000e+00 : f32
    %34 = vector.broadcast %cst_18 : f32 to vector<2x32xf32>
    %35 = arith.addf %34, %33 : vector<2x32xf32>
    %36 = arith.divf %34, %35 : vector<2x32xf32>
    %37 = vector.extract_strided_slice %19 {offsets = [0, 64], sizes = [2, 32], strides = [1, 1]} : vector<2x96xf32> to vector<2x32xf32>
    %38 = vector.extract_strided_slice %20 {offsets = [0, 64], sizes = [2, 32], strides = [1, 1]} : vector<2x96xf32> to vector<2x32xf32>
    %39 = arith.addf %38, %4 : vector<2x32xf32>
    %40 = arith.mulf %28, %39 : vector<2x32xf32>
    %41 = arith.addf %37, %40 : vector<2x32xf32>
    %42 = math.tanh %41 : vector<2x32xf32>
    %cst_19 = arith.constant 1.000000e+00 : f32
    %43 = vector.broadcast %cst_19 : f32 to vector<2x32xf32>
    %44 = arith.subf %43, %36 : vector<2x32xf32>
    %45 = arith.mulf %44, %42 : vector<2x32xf32>
    %46 = arith.mulf %36, %18 : vector<2x32xf32>
    %47 = arith.addf %45, %46 : vector<2x32xf32>
    %48 = vector.extract_strided_slice %16 {offsets = [2, 0], sizes = [2, 96], strides = [1, 1]} : vector<16x96xf32> to vector<2x96xf32>
    %cst_20 = arith.constant dense<0.000000e+00> : vector<2x96xf32>
    %49 = tpu.matmul %47, %17, %cst_20 {dimension_numbers = #tpu.dot_dimension_numbers<[1], [0], [0], [1], [0, 0, 1, 1], [], []>} : vector<2x32xf32>, vector<32x96xf32>, vector<2x96xf32> -> vector<2x96xf32>
    %50 = vector.extract_strided_slice %48 {offsets = [0, 0], sizes = [2, 32], strides = [1, 1]} : vector<2x96xf32> to vector<2x32xf32>
    %51 = vector.extract_strided_slice %49 {offsets = [0, 0], sizes = [2, 32], strides = [1, 1]} : vector<2x96xf32> to vector<2x32xf32>
    %52 = arith.addf %50, %51 : vector<2x32xf32>
    %53 = arith.negf %52 : vector<2x32xf32>
    %54 = math.exp %53 : vector<2x32xf32>
    %cst_21 = arith.constant 1.000000e+00 : f32
    %55 = vector.broadcast %cst_21 : f32 to vector<2x32xf32>
    %56 = arith.addf %55, %54 : vector<2x32xf32>
    %57 = arith.divf %55, %56 : vector<2x32xf32>
    %58 = vector.extract_strided_slice %48 {offsets = [0, 32], sizes = [2, 32], strides = [1, 1]} : vector<2x96xf32> to vector<2x32xf32>
    %59 = vector.extract_strided_slice %49 {offsets = [0, 32], sizes = [2, 32], strides = [1, 1]} : vector<2x96xf32> to vector<2x32xf32>
    %60 = arith.addf %58, %59 : vector<2x32xf32>
    %61 = arith.negf %60 : vector<2x32xf32>
    %62 = math.exp %61 : vector<2x32xf32>
    %cst_22 = arith.constant 1.000000e+00 : f32
    %63 = vector.broadcast %cst_22 : f32 to vector<2x32xf32>
    %64 = arith.addf %63, %62 : vector<2x32xf32>
    %65 = arith.divf %63, %64 : vector<2x32xf32>
    %66 = vector.extract_strided_slice %48 {offsets = [0, 64], sizes = [2, 32], strides = [1, 1]} : vector<2x96xf32> to vector<2x32xf32>
    %67 = vector.extract_strided_slice %49 {offsets = [0, 64], sizes = [2, 32], strides = [1, 1]} : vector<2x96xf32> to vector<2x32xf32>
    %68 = arith.addf %67, %4 : vector<2x32xf32>
    %69 = arith.mulf %57, %68 : vector<2x32xf32>
    %70 = arith.addf %66, %69 : vector<2x32xf32>
    %71 = math.tanh %70 : vector<2x32xf32>
    %cst_23 = arith.constant 1.000000e+00 : f32
    %72 = vector.broadcast %cst_23 : f32 to vector<2x32xf32>
    %73 = arith.subf %72, %65 : vector<2x32xf32>
    %74 = arith.mulf %73, %71 : vector<2x32xf32>
    %75 = arith.mulf %65, %47 : vector<2x32xf32>
    %76 = arith.addf %74, %75 : vector<2x32xf32>
    %77 = vector.extract_strided_slice %16 {offsets = [4, 0], sizes = [2, 96], strides = [1, 1]} : vector<16x96xf32> to vector<2x96xf32>
    %cst_24 = arith.constant dense<0.000000e+00> : vector<2x96xf32>
    %78 = tpu.matmul %76, %17, %cst_24 {dimension_numbers = #tpu.dot_dimension_numbers<[1], [0], [0], [1], [0, 0, 1, 1], [], []>} : vector<2x32xf32>, vector<32x96xf32>, vector<2x96xf32> -> vector<2x96xf32>
    %79 = vector.extract_strided_slice %77 {offsets = [0, 0], sizes = [2, 32], strides = [1, 1]} : vector<2x96xf32> to vector<2x32xf32>
    %80 = vector.extract_strided_slice %78 {offsets = [0, 0], sizes = [2, 32], strides = [1, 1]} : vector<2x96xf32> to vector<2x32xf32>
    %81 = arith.addf %79, %80 : vector<2x32xf32>
    %82 = arith.negf %81 : vector<2x32xf32>
    %83 = math.exp %82 : vector<2x32xf32>
    %cst_25 = arith.constant 1.000000e+00 : f32
    %84 = vector.broadcast %cst_25 : f32 to vector<2x32xf32>
    %85 = arith.addf %84, %83 : vector<2x32xf32>
    %86 = arith.divf %84, %85 : vector<2x32xf32>
    %87 = vector.extract_strided_slice %77 {offsets = [0, 32], sizes = [2, 32], strides = [1, 1]} : vector<2x96xf32> to vector<2x32xf32>
    %88 = vector.extract_strided_slice %78 {offsets = [0, 32], sizes = [2, 32], strides = [1, 1]} : vector<2x96xf32> to vector<2x32xf32>
    %89 = arith.addf %87, %88 : vector<2x32xf32>
    %90 = arith.negf %89 : vector<2x32xf32>
    %91 = math.exp %90 : vector<2x32xf32>
    %cst_26 = arith.constant 1.000000e+00 : f32
    %92 = vector.broadcast %cst_26 : f32 to vector<2x32xf32>
    %93 = arith.addf %92, %91 : vector<2x32xf32>
    %94 = arith.divf %92, %93 : vector<2x32xf32>
    %95 = vector.extract_strided_slice %77 {offsets = [0, 64], sizes = [2, 32], strides = [1, 1]} : vector<2x96xf32> to vector<2x32xf32>
    %96 = vector.extract_strided_slice %78 {offsets = [0, 64], sizes = [2, 32], strides = [1, 1]} : vector<2x96xf32> to vector<2x32xf32>
    %97 = arith.addf %96, %4 : vector<2x32xf32>
    %98 = arith.mulf %86, %97 : vector<2x32xf32>
    %99 = arith.addf %95, %98 : vector<2x32xf32>
    %100 = math.tanh %99 : vector<2x32xf32>
    %cst_27 = arith.constant 1.000000e+00 : f32
    %101 = vector.broadcast %cst_27 : f32 to vector<2x32xf32>
    %102 = arith.subf %101, %94 : vector<2x32xf32>
    %103 = arith.mulf %102, %100 : vector<2x32xf32>
    %104 = arith.mulf %94, %76 : vector<2x32xf32>
    %105 = arith.addf %103, %104 : vector<2x32xf32>
    %106 = vector.extract_strided_slice %16 {offsets = [6, 0], sizes = [2, 96], strides = [1, 1]} : vector<16x96xf32> to vector<2x96xf32>
    %cst_28 = arith.constant dense<0.000000e+00> : vector<2x96xf32>
    %107 = tpu.matmul %105, %17, %cst_28 {dimension_numbers = #tpu.dot_dimension_numbers<[1], [0], [0], [1], [0, 0, 1, 1], [], []>} : vector<2x32xf32>, vector<32x96xf32>, vector<2x96xf32> -> vector<2x96xf32>
    %108 = vector.extract_strided_slice %106 {offsets = [0, 0], sizes = [2, 32], strides = [1, 1]} : vector<2x96xf32> to vector<2x32xf32>
    %109 = vector.extract_strided_slice %107 {offsets = [0, 0], sizes = [2, 32], strides = [1, 1]} : vector<2x96xf32> to vector<2x32xf32>
    %110 = arith.addf %108, %109 : vector<2x32xf32>
    %111 = arith.negf %110 : vector<2x32xf32>
    %112 = math.exp %111 : vector<2x32xf32>
    %cst_29 = arith.constant 1.000000e+00 : f32
    %113 = vector.broadcast %cst_29 : f32 to vector<2x32xf32>
    %114 = arith.addf %113, %112 : vector<2x32xf32>
    %115 = arith.divf %113, %114 : vector<2x32xf32>
    %116 = vector.extract_strided_slice %106 {offsets = [0, 32], sizes = [2, 32], strides = [1, 1]} : vector<2x96xf32> to vector<2x32xf32>
    %117 = vector.extract_strided_slice %107 {offsets = [0, 32], sizes = [2, 32], strides = [1, 1]} : vector<2x96xf32> to vector<2x32xf32>
    %118 = arith.addf %116, %117 : vector<2x32xf32>
    %119 = arith.negf %118 : vector<2x32xf32>
    %120 = math.exp %119 : vector<2x32xf32>
    %cst_30 = arith.constant 1.000000e+00 : f32
    %121 = vector.broadcast %cst_30 : f32 to vector<2x32xf32>
    %122 = arith.addf %121, %120 : vector<2x32xf32>
    %123 = arith.divf %121, %122 : vector<2x32xf32>
    %124 = vector.extract_strided_slice %106 {offsets = [0, 64], sizes = [2, 32], strides = [1, 1]} : vector<2x96xf32> to vector<2x32xf32>
    %125 = vector.extract_strided_slice %107 {offsets = [0, 64], sizes = [2, 32], strides = [1, 1]} : vector<2x96xf32> to vector<2x32xf32>
    %126 = arith.addf %125, %4 : vector<2x32xf32>
    %127 = arith.mulf %115, %126 : vector<2x32xf32>
    %128 = arith.addf %124, %127 : vector<2x32xf32>
    %129 = math.tanh %128 : vector<2x32xf32>
    %cst_31 = arith.constant 1.000000e+00 : f32
    %130 = vector.broadcast %cst_31 : f32 to vector<2x32xf32>
    %131 = arith.subf %130, %123 : vector<2x32xf32>
    %132 = arith.mulf %131, %129 : vector<2x32xf32>
    %133 = arith.mulf %123, %105 : vector<2x32xf32>
    %134 = arith.addf %132, %133 : vector<2x32xf32>
    %135 = vector.extract_strided_slice %16 {offsets = [8, 0], sizes = [2, 96], strides = [1, 1]} : vector<16x96xf32> to vector<2x96xf32>
    %cst_32 = arith.constant dense<0.000000e+00> : vector<2x96xf32>
    %136 = tpu.matmul %134, %17, %cst_32 {dimension_numbers = #tpu.dot_dimension_numbers<[1], [0], [0], [1], [0, 0, 1, 1], [], []>} : vector<2x32xf32>, vector<32x96xf32>, vector<2x96xf32> -> vector<2x96xf32>
    %137 = vector.extract_strided_slice %135 {offsets = [0, 0], sizes = [2, 32], strides = [1, 1]} : vector<2x96xf32> to vector<2x32xf32>
    %138 = vector.extract_strided_slice %136 {offsets = [0, 0], sizes = [2, 32], strides = [1, 1]} : vector<2x96xf32> to vector<2x32xf32>
    %139 = arith.addf %137, %138 : vector<2x32xf32>
    %140 = arith.negf %139 : vector<2x32xf32>
    %141 = math.exp %140 : vector<2x32xf32>
    %cst_33 = arith.constant 1.000000e+00 : f32
    %142 = vector.broadcast %cst_33 : f32 to vector<2x32xf32>
    %143 = arith.addf %142, %141 : vector<2x32xf32>
    %144 = arith.divf %142, %143 : vector<2x32xf32>
    %145 = vector.extract_strided_slice %135 {offsets = [0, 32], sizes = [2, 32], strides = [1, 1]} : vector<2x96xf32> to vector<2x32xf32>
    %146 = vector.extract_strided_slice %136 {offsets = [0, 32], sizes = [2, 32], strides = [1, 1]} : vector<2x96xf32> to vector<2x32xf32>
    %147 = arith.addf %145, %146 : vector<2x32xf32>
    %148 = arith.negf %147 : vector<2x32xf32>
    %149 = math.exp %148 : vector<2x32xf32>
    %cst_34 = arith.constant 1.000000e+00 : f32
    %150 = vector.broadcast %cst_34 : f32 to vector<2x32xf32>
    %151 = arith.addf %150, %149 : vector<2x32xf32>
    %152 = arith.divf %150, %151 : vector<2x32xf32>
    %153 = vector.extract_strided_slice %135 {offsets = [0, 64], sizes = [2, 32], strides = [1, 1]} : vector<2x96xf32> to vector<2x32xf32>
    %154 = vector.extract_strided_slice %136 {offsets = [0, 64], sizes = [2, 32], strides = [1, 1]} : vector<2x96xf32> to vector<2x32xf32>
    %155 = arith.addf %154, %4 : vector<2x32xf32>
    %156 = arith.mulf %144, %155 : vector<2x32xf32>
    %157 = arith.addf %153, %156 : vector<2x32xf32>
    %158 = math.tanh %157 : vector<2x32xf32>
    %cst_35 = arith.constant 1.000000e+00 : f32
    %159 = vector.broadcast %cst_35 : f32 to vector<2x32xf32>
    %160 = arith.subf %159, %152 : vector<2x32xf32>
    %161 = arith.mulf %160, %158 : vector<2x32xf32>
    %162 = arith.mulf %152, %134 : vector<2x32xf32>
    %163 = arith.addf %161, %162 : vector<2x32xf32>
    %164 = vector.extract_strided_slice %16 {offsets = [10, 0], sizes = [2, 96], strides = [1, 1]} : vector<16x96xf32> to vector<2x96xf32>
    %cst_36 = arith.constant dense<0.000000e+00> : vector<2x96xf32>
    %165 = tpu.matmul %163, %17, %cst_36 {dimension_numbers = #tpu.dot_dimension_numbers<[1], [0], [0], [1], [0, 0, 1, 1], [], []>} : vector<2x32xf32>, vector<32x96xf32>, vector<2x96xf32> -> vector<2x96xf32>
    %166 = vector.extract_strided_slice %164 {offsets = [0, 0], sizes = [2, 32], strides = [1, 1]} : vector<2x96xf32> to vector<2x32xf32>
    %167 = vector.extract_strided_slice %165 {offsets = [0, 0], sizes = [2, 32], strides = [1, 1]} : vector<2x96xf32> to vector<2x32xf32>
    %168 = arith.addf %166, %167 : vector<2x32xf32>
    %169 = arith.negf %168 : vector<2x32xf32>
    %170 = math.exp %169 : vector<2x32xf32>
    %cst_37 = arith.constant 1.000000e+00 : f32
    %171 = vector.broadcast %cst_37 : f32 to vector<2x32xf32>
    %172 = arith.addf %171, %170 : vector<2x32xf32>
    %173 = arith.divf %171, %172 : vector<2x32xf32>
    %174 = vector.extract_strided_slice %164 {offsets = [0, 32], sizes = [2, 32], strides = [1, 1]} : vector<2x96xf32> to vector<2x32xf32>
    %175 = vector.extract_strided_slice %165 {offsets = [0, 32], sizes = [2, 32], strides = [1, 1]} : vector<2x96xf32> to vector<2x32xf32>
    %176 = arith.addf %174, %175 : vector<2x32xf32>
    %177 = arith.negf %176 : vector<2x32xf32>
    %178 = math.exp %177 : vector<2x32xf32>
    %cst_38 = arith.constant 1.000000e+00 : f32
    %179 = vector.broadcast %cst_38 : f32 to vector<2x32xf32>
    %180 = arith.addf %179, %178 : vector<2x32xf32>
    %181 = arith.divf %179, %180 : vector<2x32xf32>
    %182 = vector.extract_strided_slice %164 {offsets = [0, 64], sizes = [2, 32], strides = [1, 1]} : vector<2x96xf32> to vector<2x32xf32>
    %183 = vector.extract_strided_slice %165 {offsets = [0, 64], sizes = [2, 32], strides = [1, 1]} : vector<2x96xf32> to vector<2x32xf32>
    %184 = arith.addf %183, %4 : vector<2x32xf32>
    %185 = arith.mulf %173, %184 : vector<2x32xf32>
    %186 = arith.addf %182, %185 : vector<2x32xf32>
    %187 = math.tanh %186 : vector<2x32xf32>
    %cst_39 = arith.constant 1.000000e+00 : f32
    %188 = vector.broadcast %cst_39 : f32 to vector<2x32xf32>
    %189 = arith.subf %188, %181 : vector<2x32xf32>
    %190 = arith.mulf %189, %187 : vector<2x32xf32>
    %191 = arith.mulf %181, %163 : vector<2x32xf32>
    %192 = arith.addf %190, %191 : vector<2x32xf32>
    %193 = vector.extract_strided_slice %16 {offsets = [12, 0], sizes = [2, 96], strides = [1, 1]} : vector<16x96xf32> to vector<2x96xf32>
    %cst_40 = arith.constant dense<0.000000e+00> : vector<2x96xf32>
    %194 = tpu.matmul %192, %17, %cst_40 {dimension_numbers = #tpu.dot_dimension_numbers<[1], [0], [0], [1], [0, 0, 1, 1], [], []>} : vector<2x32xf32>, vector<32x96xf32>, vector<2x96xf32> -> vector<2x96xf32>
    %195 = vector.extract_strided_slice %193 {offsets = [0, 0], sizes = [2, 32], strides = [1, 1]} : vector<2x96xf32> to vector<2x32xf32>
    %196 = vector.extract_strided_slice %194 {offsets = [0, 0], sizes = [2, 32], strides = [1, 1]} : vector<2x96xf32> to vector<2x32xf32>
    %197 = arith.addf %195, %196 : vector<2x32xf32>
    %198 = arith.negf %197 : vector<2x32xf32>
    %199 = math.exp %198 : vector<2x32xf32>
    %cst_41 = arith.constant 1.000000e+00 : f32
    %200 = vector.broadcast %cst_41 : f32 to vector<2x32xf32>
    %201 = arith.addf %200, %199 : vector<2x32xf32>
    %202 = arith.divf %200, %201 : vector<2x32xf32>
    %203 = vector.extract_strided_slice %193 {offsets = [0, 32], sizes = [2, 32], strides = [1, 1]} : vector<2x96xf32> to vector<2x32xf32>
    %204 = vector.extract_strided_slice %194 {offsets = [0, 32], sizes = [2, 32], strides = [1, 1]} : vector<2x96xf32> to vector<2x32xf32>
    %205 = arith.addf %203, %204 : vector<2x32xf32>
    %206 = arith.negf %205 : vector<2x32xf32>
    %207 = math.exp %206 : vector<2x32xf32>
    %cst_42 = arith.constant 1.000000e+00 : f32
    %208 = vector.broadcast %cst_42 : f32 to vector<2x32xf32>
    %209 = arith.addf %208, %207 : vector<2x32xf32>
    %210 = arith.divf %208, %209 : vector<2x32xf32>
    %211 = vector.extract_strided_slice %193 {offsets = [0, 64], sizes = [2, 32], strides = [1, 1]} : vector<2x96xf32> to vector<2x32xf32>
    %212 = vector.extract_strided_slice %194 {offsets = [0, 64], sizes = [2, 32], strides = [1, 1]} : vector<2x96xf32> to vector<2x32xf32>
    %213 = arith.addf %212, %4 : vector<2x32xf32>
    %214 = arith.mulf %202, %213 : vector<2x32xf32>
    %215 = arith.addf %211, %214 : vector<2x32xf32>
    %216 = math.tanh %215 : vector<2x32xf32>
    %cst_43 = arith.constant 1.000000e+00 : f32
    %217 = vector.broadcast %cst_43 : f32 to vector<2x32xf32>
    %218 = arith.subf %217, %210 : vector<2x32xf32>
    %219 = arith.mulf %218, %216 : vector<2x32xf32>
    %220 = arith.mulf %210, %192 : vector<2x32xf32>
    %221 = arith.addf %219, %220 : vector<2x32xf32>
    %222 = vector.extract_strided_slice %16 {offsets = [14, 0], sizes = [2, 96], strides = [1, 1]} : vector<16x96xf32> to vector<2x96xf32>
    %cst_44 = arith.constant dense<0.000000e+00> : vector<2x96xf32>
    %223 = tpu.matmul %221, %17, %cst_44 {dimension_numbers = #tpu.dot_dimension_numbers<[1], [0], [0], [1], [0, 0, 1, 1], [], []>} : vector<2x32xf32>, vector<32x96xf32>, vector<2x96xf32> -> vector<2x96xf32>
    %224 = vector.extract_strided_slice %222 {offsets = [0, 0], sizes = [2, 32], strides = [1, 1]} : vector<2x96xf32> to vector<2x32xf32>
    %225 = vector.extract_strided_slice %223 {offsets = [0, 0], sizes = [2, 32], strides = [1, 1]} : vector<2x96xf32> to vector<2x32xf32>
    %226 = arith.addf %224, %225 : vector<2x32xf32>
    %227 = arith.negf %226 : vector<2x32xf32>
    %228 = math.exp %227 : vector<2x32xf32>
    %cst_45 = arith.constant 1.000000e+00 : f32
    %229 = vector.broadcast %cst_45 : f32 to vector<2x32xf32>
    %230 = arith.addf %229, %228 : vector<2x32xf32>
    %231 = arith.divf %229, %230 : vector<2x32xf32>
    %232 = vector.extract_strided_slice %222 {offsets = [0, 32], sizes = [2, 32], strides = [1, 1]} : vector<2x96xf32> to vector<2x32xf32>
    %233 = vector.extract_strided_slice %223 {offsets = [0, 32], sizes = [2, 32], strides = [1, 1]} : vector<2x96xf32> to vector<2x32xf32>
    %234 = arith.addf %232, %233 : vector<2x32xf32>
    %235 = arith.negf %234 : vector<2x32xf32>
    %236 = math.exp %235 : vector<2x32xf32>
    %cst_46 = arith.constant 1.000000e+00 : f32
    %237 = vector.broadcast %cst_46 : f32 to vector<2x32xf32>
    %238 = arith.addf %237, %236 : vector<2x32xf32>
    %239 = arith.divf %237, %238 : vector<2x32xf32>
    %240 = vector.extract_strided_slice %222 {offsets = [0, 64], sizes = [2, 32], strides = [1, 1]} : vector<2x96xf32> to vector<2x32xf32>
    %241 = vector.extract_strided_slice %223 {offsets = [0, 64], sizes = [2, 32], strides = [1, 1]} : vector<2x96xf32> to vector<2x32xf32>
    %242 = arith.addf %241, %4 : vector<2x32xf32>
    %243 = arith.mulf %231, %242 : vector<2x32xf32>
    %244 = arith.addf %240, %243 : vector<2x32xf32>
    %245 = math.tanh %244 : vector<2x32xf32>
    %cst_47 = arith.constant 1.000000e+00 : f32
    %246 = vector.broadcast %cst_47 : f32 to vector<2x32xf32>
    %247 = arith.subf %246, %239 : vector<2x32xf32>
    %248 = arith.mulf %247, %245 : vector<2x32xf32>
    %249 = arith.mulf %239, %221 : vector<2x32xf32>
    %250 = arith.addf %248, %249 : vector<2x32xf32>
    %c0_48 = arith.constant 0 : index
    %c0_49 = arith.constant 0 : index
    %251 = vector.load %arg5[%c0_48, %c0_49] : memref<32x4xf32, #tpu.memory_space<vmem>>, vector<32x4xf32>
    %cst_50 = arith.constant dense<0.000000e+00> : vector<2x4xf32>
    %252 = tpu.matmul %250, %251, %cst_50 {dimension_numbers = #tpu.dot_dimension_numbers<[1], [0], [0], [1], [0, 0, 1, 1], [], []>} : vector<2x32xf32>, vector<32x4xf32>, vector<2x4xf32> -> vector<2x4xf32>
    %253 = vector.broadcast %5 : vector<1x4xf32> to vector<2x4xf32>
    %254 = arith.addf %252, %253 : vector<2x4xf32>
    %c0_51 = arith.constant 0 : index
    %c0_52 = arith.constant 0 : index
    %255 = vector.load %arg7[%c0_51, %c0_52] : memref<2x4xf32, #tpu.memory_space<vmem>>, vector<2x4xf32>
    tpu.vector_store %arg7[%c0_51, %c0_52], %254 {strides = array<i32>} : memref<2x4xf32, #tpu.memory_space<vmem>>, vector<2x4xf32>,
    return
  }
}

</mosaic_0001>

<bundles_post_ra>
// kernel: tpu_custom_call.1
= control target key start
LH: loop header
LB: loop body
LE: loop exit
PB: predicated region body
PF: predicated region fallthrough
CT: control target
= control target key end

     0   :  { %12 = vsyncpa [#allocation3], 0  ;;  %s1821_s0 = inlined_call_operand.vmem [shape: f32[16,4], index: 0, kind: input, shape index: {}]   ;;  %s1822_s1 = inlined_call_operand.vmem [shape: f32[2,32], index: 1, kind: input, shape index: {}]   ;;  %s1823_s2 = inlined_call_operand.hbm [shape: f32[4,32], index: 2, kind: input, shape index: {}]   ;;  %s1824_s3 = inlined_call_operand.vmem [shape: f32[32,96], index: 3, kind: input, shape index: {}]   ;;  %s1825_s4 = inlined_call_operand.vmem [shape: f32[32,96], index: 4, kind: input, shape index: {}]   ;;  %s1826_s5 = inlined_call_operand.vmem [shape: f32[32,4], index: 5, kind: input, shape index: {}]   ;;  %s1827_s6 = inlined_call_operand.vmem [shape: f32[8,128], index: 6, kind: input, shape index: {}]   ;;  %s1828_s7 = inlined_call_operand.hbm [shape: f32[2,4], index: 7, kind: output, shape index: {}]  }
   0x1   :  { %13 = vsyncpa [#allocation4], 0  ;;  %s1562_s24 = smov [#allocation2]   ;;  %s1514_s28 = scalar_lea.hbm %s1823_s2, 64 }
   0x2   :  { %s24_s25 = sshll.u32 %s1562_s24, 4  ;;  %p1515_p0 = scmp.ne.s32.totalorder %s1823_s2, %s1514_s28  ;;  %s25_s25 = int_to_ptr.vmem [resolvable:$true] %s24_s25 }
   0x3   :  { %p1518_p1 = scmp.lt.u32.totalorder %s1514_s28, %s1823_s2 }
   0x5   :  { %p1520_p2 = pnand %p1518_p1, %p1515_p0 }
   0x7   :  { %1523 = shalt.err (!%p1520_p2)
}
   0x8   :  { %s1524_s10 = scalar_lea.vmem %s25_s25, 64  ;;  %p1529_p4 = scmp.lt.s32.totalorder %s25_s25, %s25_s25 }
   0x9   :  { %p1525_p3 = scmp.ne.s32.totalorder %s25_s25, %s1524_s10  ;;  %p1530_p5 = scmp.lt.s32.totalorder %s1524_s10, %s1524_s10 }
   0xb   :  { %p1531_p6 = por %p1530_p5, %p1529_p4 }
   0xd   :  { %p1532_p7 = pnand %p1531_p6, %p1525_p3 }
   0xf   :  { %1535 = shalt.err (!%p1532_p7)
}
  0x10   :  { %27 = dma.hbm_to_vmem [thread:$0]  %s1823_s2, 64, %s25_s25, [#allocation3]  }
  0x11   :  { %1558 = dma.done.wait [#allocation3], 64  }
  0x12   :  { %1559 = vsyncadd [#allocation3], 4294967232  ;;  %vm61_vm0 = vcmask 1043456   ;;  %vm54_vm1 = vcmask 31744   ;;  %v49_v0 = vld [vmem:[#allocation2] sm:$0xf] }
  0x13   :  { %v47_v1 = vld [vmem:[%s1821_s0] sm:$0xff]  ;;  %v48_v2 = vld [vmem:[%s1821_s0 + $0x8] sm:$0xff]  ;;  %1281 = vmatprep.subr.msk.mxu0 %vm61_vm0, %v49_v0  ;;  %v234_v5 = vld [vmem:[%s1825_s4 + $0x10] sm:$0xff]  ;;  %v1563_v9 = vmov 0.0|0.0   ;;  %vm1564_vm2 = vmmov 0   ;;  %v1565_v12 = vmov 0.0  }
  0x14   :  { %1283 = vmatprep.mubr.msk.f32.mxu0 %vm54_vm1, %v47_v1  ;;  %v232_v3 = vld [vmem:[%s1825_s4] sm:$0xff]  ;;  %v233_v4 = vld [vmem:[%s1825_s4 + $0x8] sm:$0xff]  ;;  %1282 = vmatpush3.msk.msra.mxu0 %vm61_vm0, %v49_v0  ;;  %v235_v7 = vld [vmem:[%s1825_s4 + $0x18] sm:$0xff]  ;;  %vm150_vm3 = vcmask 261120   ;;  %s1566_s10 = smov 64   ;;  %s1568_s15 = smov 96  }
  0x15   :  { %v1637_v6 = vpack.c.bf16 %v233_v4, %v232_v3  ;;  %v142_v8 = vld [vmem:[%s1824_s3] sm:$0xff]  ;;  %1284 = vmatmul.mubr.msk.f32.vlgmr.msra.gmra.mrb[0].mxu0 %vm54_vm1, %v48_v2  ;;  %1404 = vmatprep.subr.bf16.mxu0 %v1563_v9  ;;  %v143_v10 = vld [vmem:[%s1824_s3 + $0x8] sm:$0xff]  ;;  %v1650_v11 = vpack.c.bf16 %v235_v7, %v234_v5  ;;  %v144_v15 = vld [vmem:[%s1824_s3 + $0x10] sm:$0xff]  ;;  %s1569_s0 = smov [#allocation5]   ;;  %vm1184_vm4 = vcmask 25600  }
  0x16   :  { %1305 = vmatprep.mubr.msk.f32.mxu0 %vm1564_vm2, %v1565_v12  ;;  %v1396_v13 = vpack.c.bf16 %v143_v10, %v142_v8  ;;  %v236_v14 = vld [vmem:[%s1822_s1] sm:$0x3]  ;;  %v145_v16 = vld [vmem:[%s1824_s3 + $0x18] sm:$0xff]  ;;  %v1201_v18 = vld [vmem:[%s1827_s6 + $0x2] ss:$0 sm:$0xff]  ;;  %s1567_s3 = smov 32  }
  0x17   :  { %1406 = vmatpush3.bf16.msra.mxu0 %v1637_v6  ;;  %v1400_v17 = vpack.c.bf16 %v145_v16, %v144_v15  ;;  %318 = vrot.lane.b32.xlu0 %v1201_v18, %s1566_s10  ;;  %v1202_v19 = vld [vmem:[%s1827_s6] ss:$0 sm:$0xff]  ;;  %v1206_v30 = vld [vmem:[%s1827_s6 + $0x1] ss:$0 sm:$0xff]  ;;  %s1192_s24 = sshll.u32 %s1569_s0, 4  ;;  %s1193_s24 = int_to_ptr.vmem [resolvable:$true] %s1192_s24 }
  0x18   :  { %1407 = vmatprep.subr.bf16.mxu0 %v1563_v9  ;;  %1397 = vmatprep.subr.bf16.mxu1 %v1396_v13  ;;  %s1536_s25 = scalar_lea.vmem %s1193_s24, 32  ;;  %p1541_p9 = scmp.lt.s32.totalorder %s1193_s24, %s1193_s24 }
  0x19   :  { %1399 = vmatpush3.bf16.msra.mxu1 %v1396_v13  ;;  %p1537_p8 = scmp.ne.s32.totalorder %s1193_s24, %s1536_s25  ;;  %p1542_p10 = scmp.lt.s32.totalorder %s1536_s25, %s1536_s25 }
  0x1a   :  { %1401 = vmatprep.subr.bf16.mxu1 %v1400_v17 }
  0x1b   :  { %1409 = vmatpush3.bf16.msra.mxu0 %v1650_v11  ;;  %p1543_p11 = por %p1542_p10, %p1541_p9 }
  0x1c   :  { %1416 = vmatprep.subr.bf16.mxu0 %v1563_v9 }
  0x1d   :  { %1403 = vmatpush3.bf16.msra.mxu1 %v1400_v17  ;;  %p1544_p12 = pnand %p1543_p11, %p1537_p8 }
  0x1e   :  { %1306 = vmatmul.mubr.msk.f32.vlgmr.msra.gmra.mrb[2].mxu0 %vm150_vm3, %v236_v14  ;;  %1410 = vmatprep.subr.bf16.mxu1 %v1563_v9 }
  0x1f   :  { %1418 = vmatpush3.bf16.msra.mxu0 %v1637_v6  ;;  %1327 = vmatprep.mubr.msk.f32.mxu0 %vm1564_vm2, %v1565_v12 }
  0x20   :  { %1419 = vmatprep.subr.bf16.mxu0 %v1563_v9 }
  0x23   :  { %1421 = vmatpush3.bf16.msra.mxu0 %v1650_v11 }
  0x24   :  { %1428 = vmatprep.subr.bf16.mxu0 %v1563_v9 }
  0x89   :  { %v1682_v26 = vpop.permute.xlu0 %318 }
  0xe8   :  { %v1285_v20 = vpop.f32.mrb[0].mxu0 }
  0xe9   :  { %v137_v21 = vadd.f32 %v1285_v20, %v1202_v19  ;;  %v131_v22 = vpop.f32.mrb[1].mxu0 }
  0xea   :  { %v132_v23 = vadd.f32 %v1202_v19, %v131_v22 }
  0xeb   :  { %v141_v25 = vmax.f32 %v137_v21, 0.0 }
  0xec   :  { %v140_v24 = vmax.f32 %v132_v23, 0.0 }
  0xee   :  { %1294 = vmatprep.mubr.msk.f32.mxu1 %vm150_vm3, %v140_v24 }
  0xef   :  { %1295 = vmatmul.mubr.msk.f32.vlgmr.msra.gmra.mrb[0].mxu1 %vm150_vm3, %v141_v25 }
  0xf0   :  { %1412 = vmatpush3.bf16.msra.mxu1 %v1637_v6  ;;  %1316 = vmatprep.mubr.msk.f32.mxu1 %vm1564_vm2, %v1565_v12 }
  0xf1   :  { %v306_v27 = vpop.f32.mrb[2].mxu0  ;;  %1413 = vmatprep.subr.bf16.mxu1 %v1563_v9 }
  0xf2   :  { %v321_v28 = vadd.f32 %v1682_v26, %v306_v27  ;;  %v1307_v29 = vpop.f32.mrb[3].mxu0 }
  0xf4   :  { %323 = vrot.lane.b32.xlu0 %v321_v28, %s1566_s10  ;;  %1415 = vmatpush3.bf16.msra.mxu1 %v1650_v11 }
  0xf5   :  { %1422 = vmatprep.subr.bf16.mxu1 %v1563_v9 }
  0xf8   :  { %339 = vrot.lane.b32.xlu0 %v236_v14, %s1567_s3 }
 0x166   :  { %v324_v40 = vpop.permute.xlu0 %323 }
 0x16a   :  { %v340_v45 = vpop.permute.xlu0 %339 }
 0x1c2   :  { %v1296_v31 = vpop.f32.mrb[0].mxu1 }
 0x1c3   :  { %v1696_v32 = vadd.f32 %v1296_v31, %v1206_v30  ;;  %v223_v33 = vpop.f32.mrb[1].mxu1 }
 0x1c4   :  { %v1698_v34 = vadd.f32 %v1206_v30, %v223_v33 }
 0x1c6   :  { %v310_v35 = vadd.f32 %v306_v27, %v1698_v34 }
 0x1c8   :  { %v1210_v36 = vmul.f32 -1.442695, %v310_v35 }
 0x1ca   :  { %1466 = vpow2.f32 %v1210_v36 }
 0x1d4   :  { %v1467_v37 = vpop.eup %1466 }
 0x1d5   :  { %v314_v38 = vadd.f32 1.0, %v1467_v37 }
 0x1d7   :  { %1468 = vrcp.f32 %v314_v38 }
 0x1e1   :  { %v1469_v39 = vpop.eup %1468 }
 0x1e2   :  { %v326_v41 = vmul.f32 %v1469_v39, %v324_v40  ;;  %v333_v46 = vsub.f32 1.0, %v1469_v39  ;;  %v342_v48 = vmul.f32 %v1469_v39, %v340_v45 }
 0x1e4   :  { %328 = vrot.lane.b32.xlu1 %v326_v41, %s1566_s10 }
 0x256   :  { %v329_v42 = vpop.permute.xlu1 %328 }
 0x257   :  { %v331_v43 = vadd.f32 %v329_v42, %v1698_v34 }
 0x259   :  { %1470 = vtanh.f32 %v331_v43 }
 0x263   :  { %v1471_v44 = vpop.eup %1470 }
 0x264   :  { %335 = vrot.lane.b32.xlu1 %v1471_v44, %s1568_s15 }
 0x2d6   :  { %v336_v47 = vpop.permute.xlu1 %335 }
 0x2d7   :  { %v338_v49 = vmul.f32 %v336_v47, %v333_v46 }
 0x2d9   :  { %v343_v50 = vadd.f32 %v342_v48, %v338_v49 }
 0x2db   :  { %345 = vrot.lane.b32.xlu1 %v343_v50, %s1568_s15  ;;  %v448_v3 = vrot.slane %v343_v50, 6 }
 0x34d   :  { %v346_v51 = vpop.permute.xlu1 %345 }
 0x34e   :  { %1317 = vmatmul.mubr.msk.f32.vlgmr.msra.gmra.mrb[2].mxu1 %vm150_vm3, %v346_v51 }
 0x34f   :  { %1424 = vmatpush3.bf16.msra.mxu1 %v1637_v6  ;;  %1338 = vmatprep.mubr.msk.f32.mxu1 %vm1564_vm2, %v1565_v12 }
 0x350   :  { %1425 = vmatprep.subr.bf16.mxu1 %v1563_v9 }
 0x353   :  { %1427 = vmatpush3.bf16.msra.mxu1 %v1650_v11 }
 0x354   :  { %1434 = vmatprep.subr.bf16.mxu1 %v1563_v9 }
 0x421   :  { %v415_v52 = vpop.f32.mrb[2].mxu1 }
 0x422   :  { %v429_v53 = vadd.f32 %v415_v52, %v1682_v26  ;;  %v1318_v54 = vpop.f32.mrb[3].mxu1  ;;  %v420_v56 = vrot.slane %v415_v52, 6 }
 0x424   :  { %v431_v55 = vrot.slane %v429_v53, 6  ;;  %v422_v57 = vadd.f32 %v420_v56, %v1698_v34 }
 0x426   :  { %432 = vrot.lane.b32.xlu0 %v431_v55, %s1566_s10  ;;  %v1212_v58 = vmul.f32 -1.442695, %v422_v57 }
 0x428   :  { %1472 = vpow2.f32 %v1212_v58 }
 0x432   :  { %v1473_v59 = vpop.eup %1472 }
 0x433   :  { %v426_v60 = vadd.f32 1.0, %v1473_v59 }
 0x435   :  { %1474 = vrcp.f32 %v426_v60 }
 0x43f   :  { %v1475_v61 = vpop.eup %1474 }
 0x440   :  { %v442_v4 = vsub.f32 1.0, %v1475_v61  ;;  %v450_v8 = vmul.f32 %v1475_v61, %v448_v3 }
 0x498   :  { %v433_v62 = vpop.permute.xlu0 %432 }
 0x499   :  { %v435_v63 = vmul.f32 %v1475_v61, %v433_v62 }
 0x49b   :  { %437 = vrot.lane.b32.xlu1 %v435_v63, %s1566_s10 }
 0x50d   :  { %v438_v0 = vpop.permute.xlu1 %437 }
 0x50e   :  { %v440_v1 = vadd.f32 %v438_v0, %v1698_v34 }
 0x510   :  { %1476 = vtanh.f32 %v440_v1 }
 0x51a   :  { %v1477_v2 = vpop.eup %1476 }
 0x51b   :  { %444 = vrot.lane.b32.xlu0 %v1477_v2, %s1568_s15 }
 0x58d   :  { %v445_v5 = vpop.permute.xlu0 %444 }
 0x58e   :  { %v447_v7 = vmul.f32 %v445_v5, %v442_v4 }
 0x590   :  { %v451_v10 = vadd.f32 %v450_v8, %v447_v7 }
 0x592   :  { %v453_v13 = vrot.slane %v451_v10, 2  ;;  %v557_v31 = vrot.slane %v451_v10, 6 }
 0x594   :  { %454 = vrot.lane.b32.xlu1 %v453_v13, %s1568_s15 }
 0x606   :  { %v455_v14 = vpop.permute.xlu1 %454 }
 0x607   :  { %1328 = vmatmul.mubr.msk.f32.vlgmr.msra.gmra.mrb[4].mxu0 %vm150_vm3, %v455_v14 }
 0x608   :  { %1430 = vmatpush3.bf16.msra.mxu0 %v1637_v6  ;;  %1349 = vmatprep.mubr.msk.f32.mxu0 %vm1564_vm2, %v1565_v12 }
 0x609   :  { %1431 = vmatprep.subr.bf16.mxu0 %v1563_v9 }
 0x60c   :  { %1433 = vmatpush3.bf16.msra.mxu0 %v1650_v11 }
 0x60d   :  { %1440 = vmatprep.subr.bf16.mxu0 %v1563_v9 }
 0x6da   :  { %v524_v15 = vpop.f32.mrb[4].mxu0 }
 0x6db   :  { %v538_v16 = vadd.f32 %v524_v15, %v1682_v26  ;;  %v1329_v17 = vpop.f32.mrb[5].mxu0  ;;  %v529_v19 = vrot.slane %v524_v15, 4 }
 0x6dd   :  { %v540_v18 = vrot.slane %v538_v16, 4  ;;  %v531_v20 = vadd.f32 %v529_v19, %v1698_v34 }
 0x6df   :  { %541 = vrot.lane.b32.xlu0 %v540_v18, %s1566_s10  ;;  %v1214_v21 = vmul.f32 -1.442695, %v531_v20 }
 0x6e1   :  { %1478 = vpow2.f32 %v1214_v21 }
 0x6eb   :  { %v1479_v22 = vpop.eup %1478 }
 0x6ec   :  { %v535_v23 = vadd.f32 1.0, %v1479_v22 }
 0x6ee   :  { %1480 = vrcp.f32 %v535_v23 }
 0x6f8   :  { %v1481_v24 = vpop.eup %1480 }
 0x6f9   :  { %v551_v33 = vsub.f32 1.0, %v1481_v24  ;;  %v559_v36 = vmul.f32 %v1481_v24, %v557_v31 }
 0x751   :  { %v542_v25 = vpop.permute.xlu0 %541 }
 0x752   :  { %v544_v27 = vmul.f32 %v1481_v24, %v542_v25 }
 0x754   :  { %546 = vrot.lane.b32.xlu1 %v544_v27, %s1566_s10 }
 0x7c6   :  { %v547_v28 = vpop.permute.xlu1 %546 }
 0x7c7   :  { %v549_v29 = vadd.f32 %v547_v28, %v1698_v34 }
 0x7c9   :  { %1482 = vtanh.f32 %v549_v29 }
 0x7d3   :  { %v1483_v30 = vpop.eup %1482 }
 0x7d4   :  { %553 = vrot.lane.b32.xlu0 %v1483_v30, %s1568_s15 }
 0x846   :  { %v554_v35 = vpop.permute.xlu0 %553 }
 0x847   :  { %v556_v37 = vmul.f32 %v554_v35, %v551_v33 }
 0x849   :  { %v560_v38 = vadd.f32 %v559_v36, %v556_v37 }
 0x84b   :  { %v562_v39 = vrot.slane %v560_v38, 4  ;;  %v666_v56 = vrot.slane %v560_v38, 6 }
 0x84d   :  { %563 = vrot.lane.b32.xlu1 %v562_v39, %s1568_s15 }
 0x8bf   :  { %v564_v40 = vpop.permute.xlu1 %563 }
 0x8c0   :  { %1339 = vmatmul.mubr.msk.f32.vlgmr.msra.gmra.mrb[4].mxu1 %vm150_vm3, %v564_v40 }
 0x8c1   :  { %1436 = vmatpush3.bf16.msra.mxu1 %v1637_v6  ;;  %1360 = vmatprep.mubr.msk.f32.mxu1 %vm1564_vm2, %v1565_v12 }
 0x8c2   :  { %1437 = vmatprep.subr.bf16.mxu1 %v1563_v9 }
 0x8c5   :  { %1439 = vmatpush3.bf16.msra.mxu1 %v1650_v11 }
 0x8c6   :  { %1446 = vmatprep.subr.bf16.mxu1 %v1563_v9 }
 0x993   :  { %v633_v41 = vpop.f32.mrb[4].mxu1 }
 0x994   :  { %v647_v42 = vadd.f32 %v633_v41, %v1682_v26  ;;  %v1340_v43 = vpop.f32.mrb[5].mxu1  ;;  %v638_v45 = vrot.slane %v633_v41, 2 }
 0x996   :  { %v649_v44 = vrot.slane %v647_v42, 2  ;;  %v640_v46 = vadd.f32 %v638_v45, %v1698_v34 }
 0x998   :  { %650 = vrot.lane.b32.xlu0 %v649_v44, %s1566_s10  ;;  %v1216_v47 = vmul.f32 -1.442695, %v640_v46 }
 0x99a   :  { %1484 = vpow2.f32 %v1216_v47 }
 0x9a4   :  { %v1485_v48 = vpop.eup %1484 }
 0x9a5   :  { %v644_v49 = vadd.f32 1.0, %v1485_v48 }
 0x9a7   :  { %1486 = vrcp.f32 %v644_v49 }
 0x9b1   :  { %v1487_v50 = vpop.eup %1486 }
 0x9b2   :  { %v660_v57 = vsub.f32 1.0, %v1487_v50  ;;  %v668_v59 = vmul.f32 %v1487_v50, %v666_v56 }
 0xa0a   :  { %v651_v51 = vpop.permute.xlu0 %650 }
 0xa0b   :  { %v653_v52 = vmul.f32 %v1487_v50, %v651_v51 }
 0xa0d   :  { %655 = vrot.lane.b32.xlu1 %v653_v52, %s1566_s10 }
 0xa7f   :  { %v656_v53 = vpop.permute.xlu1 %655 }
 0xa80   :  { %v658_v54 = vadd.f32 %v656_v53, %v1698_v34 }
 0xa82   :  { %1488 = vtanh.f32 %v658_v54 }
 0xa8c   :  { %v1489_v55 = vpop.eup %1488 }
 0xa8d   :  { %662 = vrot.lane.b32.xlu0 %v1489_v55, %s1568_s15 }
 0xaff   :  { %v663_v58 = vpop.permute.xlu0 %662 }
 0xb00   :  { %v665_v60 = vmul.f32 %v663_v58, %v660_v57 }
 0xb02   :  { %v669_v61 = vadd.f32 %v668_v59, %v665_v60 }
 0xb04   :  { %v671_v62 = vrot.slane %v669_v61, 6 }
 0xb06   :  { %672 = vrot.lane.b32.xlu1 %v671_v62, %s1568_s15 }
 0xb78   :  { %v673_v63 = vpop.permute.xlu1 %672 }
 0xb79   :  { %1350 = vmatmul.mubr.msk.f32.vlgmr.msra.gmra.mrb[6].mxu0 %vm150_vm3, %v673_v63 }
 0xb7a   :  { %1442 = vmatpush3.bf16.msra.mxu0 %v1637_v6  ;;  %1371 = vmatprep.mubr.msk.f32.mxu0 %vm1564_vm2, %v1565_v12 }
 0xb7b   :  { %1443 = vmatprep.subr.bf16.mxu0 %v1563_v9 }
 0xb7e   :  { %1445 = vmatpush3.bf16.msra.mxu0 %v1650_v11 }
 0xb7f   :  { %1452 = vmatprep.subr.bf16.mxu0 %v1563_v9 }
 0xc4c   :  { %v742_v34 = vpop.f32.mrb[6].mxu0 }
 0xc4d   :  { %v753_v0 = vadd.f32 %v742_v34, %v1682_v26  ;;  %v1351_v1 = vpop.f32.mrb[7].mxu0  ;;  %v746_v2 = vadd.f32 %v742_v34, %v1696_v32 }
 0xc4f   :  { %755 = vrot.lane.b32.xlu0 %v753_v0, %s1566_s10  ;;  %v1218_v3 = vmul.f32 -1.442695, %v746_v2 }
 0xc51   :  { %1490 = vpow2.f32 %v1218_v3 }
 0xc5b   :  { %v1491_v4 = vpop.eup %1490 }
 0xc5c   :  { %v750_v5 = vadd.f32 1.0, %v1491_v4 }
 0xc5e   :  { %1492 = vrcp.f32 %v750_v5 }
 0xc68   :  { %v1493_v7 = vpop.eup %1492 }
 0xc69   :  { %v765_v16 = vsub.f32 1.0, %v1493_v7  ;;  %v772_v18 = vmul.f32 %v1493_v7, %v671_v62 }
 0xcc1   :  { %v756_v8 = vpop.permute.xlu0 %755 }
 0xcc2   :  { %v758_v10 = vmul.f32 %v1493_v7, %v756_v8 }
 0xcc4   :  { %760 = vrot.lane.b32.xlu1 %v758_v10, %s1566_s10 }
 0xd36   :  { %v761_v13 = vpop.permute.xlu1 %760 }
 0xd37   :  { %v763_v14 = vadd.f32 %v761_v13, %v1696_v32 }
 0xd39   :  { %1494 = vtanh.f32 %v763_v14 }
 0xd43   :  { %v1495_v15 = vpop.eup %1494 }
 0xd44   :  { %767 = vrot.lane.b32.xlu0 %v1495_v15, %s1568_s15 }
 0xdb6   :  { %v768_v17 = vpop.permute.xlu0 %767 }
 0xdb7   :  { %v770_v19 = vmul.f32 %v768_v17, %v765_v16 }
 0xdb9   :  { %v773_v20 = vadd.f32 %v772_v18, %v770_v19 }
 0xdbb   :  { %775 = vrot.lane.b32.xlu1 %v773_v20, %s1568_s15  ;;  %v878_v38 = vrot.slane %v773_v20, 6  ;;  %v1100_v20 = vld [vmem:[%s1826_s5] sm:$0xff] }
 0xe2d   :  { %v776_v21 = vpop.permute.xlu1 %775 }
 0xe2e   :  { %1361 = vmatmul.mubr.msk.f32.vlgmr.msra.gmra.mrb[6].mxu1 %vm150_vm3, %v776_v21  ;;  %v1101_v21 = vld [vmem:[%s1826_s5 + $0x8] sm:$0xff] }
 0xe2f   :  { %1448 = vmatpush3.bf16.msra.mxu1 %v1637_v6  ;;  %1382 = vmatprep.mubr.msk.f32.mxu1 %vm1564_vm2, %v1565_v12 }
 0xe30   :  { %1449 = vmatprep.subr.bf16.mxu1 %v1563_v9 }
 0xe33   :  { %1451 = vmatpush3.bf16.msra.mxu1 %v1650_v11 }
 0xf01   :  { %v845_v22 = vpop.f32.mrb[6].mxu1 }
 0xf02   :  { %v859_v23 = vadd.f32 %v845_v22, %v1682_v26  ;;  %v1362_v24 = vpop.f32.mrb[7].mxu1  ;;  %v850_v27 = vrot.slane %v845_v22, 6  ;;  %v1102_v22 = vld [vmem:[%s1826_s5 + $0x10] sm:$0xff] }
 0xf03   :  { %v1103_v24 = vld [vmem:[%s1826_s5 + $0x18] sm:$0xff] }
 0xf04   :  { %v861_v25 = vrot.slane %v859_v23, 6  ;;  %v852_v28 = vadd.f32 %v850_v27, %v1696_v32  ;;  %v1453_v23 = vpack.c.bf16 %v1101_v21, %v1100_v20 }
 0xf06   :  { %862 = vrot.lane.b32.xlu0 %v861_v25, %s1566_s10  ;;  %v1220_v29 = vmul.f32 -1.442695, %v852_v28 }
 0xf08   :  { %1496 = vpow2.f32 %v1220_v29 }
 0xf12   :  { %v1497_v6 = vpop.eup %1496 }
 0xf13   :  { %v856_v30 = vadd.f32 1.0, %v1497_v6 }
 0xf15   :  { %1498 = vrcp.f32 %v856_v30 }
 0xf1f   :  { %v1499_v31 = vpop.eup %1498 }
 0xf20   :  { %v872_v39 = vsub.f32 1.0, %v1499_v31  ;;  %v880_v42 = vmul.f32 %v1499_v31, %v878_v38 }
 0xf78   :  { %v863_v33 = vpop.permute.xlu0 %862 }
 0xf79   :  { %v865_v35 = vmul.f32 %v1499_v31, %v863_v33 }
 0xf7b   :  { %867 = vrot.lane.b32.xlu1 %v865_v35, %s1566_s10 }
 0xfed   :  { %v868_v11 = vpop.permute.xlu1 %867 }
 0xfee   :  { %v870_v36 = vadd.f32 %v868_v11, %v1696_v32 }
 0xff0   :  { %1500 = vtanh.f32 %v870_v36 }
 0xffa   :  { %v1501_v37 = vpop.eup %1500 }
 0xffb   :  { %874 = vrot.lane.b32.xlu0 %v1501_v37, %s1568_s15 }
0x106d   :  { %v875_v40 = vpop.permute.xlu0 %874 }
0x106e   :  { %v877_v41 = vmul.f32 %v875_v40, %v872_v39 }
0x1070   :  { %v881_v43 = vadd.f32 %v880_v42, %v877_v41 }
0x1072   :  { %v883_v44 = vrot.slane %v881_v43, 2  ;;  %v987_v60 = vrot.slane %v881_v43, 6 }
0x1074   :  { %884 = vrot.lane.b32.xlu1 %v883_v44, %s1568_s15 }
0x10e6   :  { %v885_v45 = vpop.permute.xlu1 %884 }
0x10e7   :  { %1372 = vmatmul.mubr.msk.f32.vlgmr.msra.gmra.mrb[8].mxu0 %vm150_vm3, %v885_v45 }
0x10e8   :  { %1393 = vmatprep.mubr.msk.f32.mxu0 %vm1564_vm2, %v1565_v12  ;;  %1454 = vmatpush3.bf16.msra.mxu0 %v1453_v23 }
0x10e9   :  { %1455 = vmatprep.subr.bf16.mxu0 %v1563_v9  ;;  %v1225_v9 = vld [vmem:[%s1827_s6 + $0x3] ss:$0 sm:$0xff] }
0x11ba   :  { %v954_v46 = vpop.f32.mrb[8].mxu0 }
0x11bb   :  { %v968_v47 = vadd.f32 %v954_v46, %v1682_v26  ;;  %v1373_v48 = vpop.f32.mrb[9].mxu0  ;;  %v959_v50 = vrot.slane %v954_v46, 4 }
0x11bd   :  { %v970_v49 = vrot.slane %v968_v47, 4  ;;  %v961_v51 = vadd.f32 %v959_v50, %v1696_v32 }
0x11bf   :  { %971 = vrot.lane.b32.xlu0 %v970_v49, %s1566_s10  ;;  %v1222_v52 = vmul.f32 -1.442695, %v961_v51 }
0x11c1   :  { %1502 = vpow2.f32 %v1222_v52 }
0x11cb   :  { %v1503_v53 = vpop.eup %1502 }
0x11cc   :  { %v965_v54 = vadd.f32 1.0, %v1503_v53 }
0x11ce   :  { %1504 = vrcp.f32 %v965_v54 }
0x11d8   :  { %v1505_v55 = vpop.eup %1504 }
0x11d9   :  { %v981_v61 = vsub.f32 1.0, %v1505_v55  ;;  %v989_v63 = vmul.f32 %v1505_v55, %v987_v60 }
0x1231   :  { %v972_v56 = vpop.permute.xlu0 %971 }
0x1232   :  { %v974_v57 = vmul.f32 %v1505_v55, %v972_v56 }
0x1234   :  { %976 = vrot.lane.b32.xlu1 %v974_v57, %s1566_s10 }
0x12a6   :  { %v977_v12 = vpop.permute.xlu1 %976 }
0x12a7   :  { %v979_v58 = vadd.f32 %v977_v12, %v1696_v32 }
0x12a9   :  { %1506 = vtanh.f32 %v979_v58 }
0x12b3   :  { %v1507_v59 = vpop.eup %1506 }
0x12b4   :  { %983 = vrot.lane.b32.xlu0 %v1507_v59, %s1568_s15 }
0x1326   :  { %v984_v62 = vpop.permute.xlu0 %983 }
0x1327   :  { %v986_v34 = vmul.f32 %v984_v62, %v981_v61 }
0x1329   :  { %v990_v0 = vadd.f32 %v989_v63, %v986_v34 }
0x132b   :  { %v992_v1 = vrot.slane %v990_v0, 4  ;;  %v1096_v27 = vrot.slane %v990_v0, 6 }
0x132d   :  { %993 = vrot.lane.b32.xlu1 %v992_v1, %s1568_s15 }
0x139f   :  { %v994_v2 = vpop.permute.xlu1 %993 }
0x13a0   :  { %1383 = vmatmul.mubr.msk.f32.vlgmr.msra.gmra.mrb[8].mxu1 %vm150_vm3, %v994_v2 }
0x1473   :  { %v1063_v3 = vpop.f32.mrb[8].mxu1 }
0x1474   :  { %v1077_v4 = vadd.f32 %v1063_v3, %v1682_v26  ;;  %v1384_v5 = vpop.f32.mrb[9].mxu1  ;;  %v1068_v8 = vrot.slane %v1063_v3, 2 }
0x1476   :  { %v1079_v7 = vrot.slane %v1077_v4, 2  ;;  %v1070_v10 = vadd.f32 %v1068_v8, %v1696_v32 }
0x1478   :  { %1080 = vrot.lane.b32.xlu0 %v1079_v7, %s1566_s10  ;;  %v1224_v13 = vmul.f32 -1.442695, %v1070_v10 }
0x147a   :  { %1508 = vpow2.f32 %v1224_v13 }
0x1484   :  { %v1509_v14 = vpop.eup %1508 }
0x1485   :  { %v1074_v15 = vadd.f32 1.0, %v1509_v14 }
0x1487   :  { %1510 = vrcp.f32 %v1074_v15 }
0x1491   :  { %v1511_v16 = vpop.eup %1510 }
0x1492   :  { %v1090_v28 = vsub.f32 1.0, %v1511_v16  ;;  %v1098_v6 = vmul.f32 %v1511_v16, %v1096_v27 }
0x14ea   :  { %v1081_v17 = vpop.permute.xlu0 %1080 }
0x14eb   :  { %v1083_v18 = vmul.f32 %v1511_v16, %v1081_v17 }
0x14ed   :  { %1085 = vrot.lane.b32.xlu1 %v1083_v18, %s1566_s10 }
0x155f   :  { %v1086_v19 = vpop.permute.xlu1 %1085 }
0x1560   :  { %v1088_v26 = vadd.f32 %v1086_v19, %v1696_v32  ;;  %v1456_v32 = vpack.c.bf16 %v1103_v24, %v1102_v22 }
0x1562   :  { %1512 = vtanh.f32 %v1088_v26  ;;  %1457 = vmatpush3.bf16.msra.mxu0 %v1456_v32 }
0x156c   :  { %v1513_v25 = vpop.eup %1512 }
0x156d   :  { %1092 = vrot.lane.b32.xlu0 %v1513_v25, %s1568_s15 }
0x15df   :  { %v1093_v29 = vpop.permute.xlu0 %1092 }
0x15e0   :  { %v1095_v30 = vmul.f32 %v1093_v29, %v1090_v28 }
0x15e2   :  { %v1099_v31 = vadd.f32 %v1098_v6, %v1095_v30 }
0x15e4   :  { %v1109_v33 = vrot.slane %v1099_v31, 6 }
0x15e6   :  { %1110 = vrot.lane.b32.xlu1 %v1109_v33, %s1568_s15 }
0x1658   :  { %v1111_v35 = vpop.permute.xlu1 %1110 }
0x1659   :  { %1394 = vmatmul.mubr.msk.f32.vlgmr.msra.gmra.mrb[10].mxu0 %vm150_vm3, %v1111_v35 }
0x172c   :  { %v1180_v11 = vpop.f32.mrb[10].mxu0 }
0x172d   :  { %v1181_v36 = vadd.f32 %v1225_v9, %v1180_v11  ;;  %v1395_v37 = vpop.f32.mrb[11].mxu0 }
0x172f   :  { %1185 = vst.msk [vmem:[#allocation5] sm:$0x3] %vm1184_vm4, %v1181_v36 }
0x1730   :  { %1547 = shalt.err (!%p1544_p12)
}
0x1731   :  { %s1548_s27 = scalar_lea.hbm %s1828_s7, 32 }
0x1732   :  { %p1549_p13 = scmp.ne.s32.totalorder %s1828_s7, %s1548_s27  ;;  %p1552_p0 = scmp.lt.u32.totalorder %s1548_s27, %s1828_s7 }
0x1734   :  { %p1554_p1 = pnand %p1552_p0, %p1549_p13 }
0x1736   :  { %1557 = shalt.err (!%p1554_p1)
}
0x1737   :  { %1195 = dma.vmem_to_hbm [thread:$0]  %s1193_s24, 32, %s1828_s7, [#allocation4]  }
0x1738   :  { %1560 = dma.done.wait [#allocation4], 32  }
0x1739   :  { %1561 = vsyncadd [#allocation4], 4294967264 }
0x173a   :  { %1199 = vsyncpa [#allocation3], 1 }
0x173b   :  { %1200 = vsyncpa [#allocation4], 1 }

</bundles_post_ra>
